<compile_context>
chip_gen: v6e
topology: v6e:2x2x1
jax: 0.10.0
libtpu: 0.0.40
codegen_flags: <defaults>
</compile_context>

<pallas_src>
import functools

import jax
import jax.numpy as jnp
from jax.experimental import pallas as pl
from jax.experimental.pallas import tpu as pltpu

NEG_SLOPE = 0.1   # darknet-style LeakyReLU slope used by horch act='leaky_relu'
BN_EPS = 1e-5


def _round_up(x, m):
    return ((x + m - 1) // m) * m


def _downblock_kernel(xm_ref, xh_ref, w_ref, b_ref, o_ref, *, TR, OW, W1, Cin):
    # xm_ref: (1, TR, 2*W1, 2*Cin) bf16  parity-folded padded rows [r*TR, r*TR+TR)
    #         xm[0, a, ph*W1 + b, pw*Cin + c] == x_padded[2*(r*TR+a)+ph, 2*b+pw, c]
    # xh_ref: (1, 1,  2*W1, 2*Cin) bf16  halo row r*TR + TR (same fold)
    # w_ref : (9*Cin, Coutp)       bf16  BN-scale-folded weights, packed per tap group
    # b_ref : (1, Coutp)           f32   folded BN bias
    # o_ref : (1, TR*OW, Coutp)    bf16
    Coutp = w_ref.shape[-1]
    C2 = 2 * Cin
    M = TR * OW

    x_cur = xm_ref[0]                                                   # rows a   (kh in {0,1})
    if TR > 1:                                                          # rows a+1 (kh == 2)
        x_nxt = jnp.concatenate([xm_ref[0, 1:], xh_ref[0]], axis=0)
    else:
        x_nxt = xh_ref[0]

    def tap(x, ph, aw, k):
        c0 = ph * W1 + aw
        return x[:, c0:c0 + OW, :k].reshape(M, k)

    # 6 matmuls instead of 9: the kw=0/kw=1 taps share a contiguous 2*Cin channel slab.
    acc = jnp.dot(tap(x_cur, 0, 0, C2), w_ref[0 * Cin:2 * Cin],
                  preferred_element_type=jnp.float32)                   # kh=0, kw in {0,1}
    acc += jnp.dot(tap(x_cur, 0, 1, Cin), w_ref[2 * Cin:3 * Cin],
                   preferred_element_type=jnp.float32)                  # kh=0, kw=2
    acc += jnp.dot(tap(x_cur, 1, 0, C2), w_ref[3 * Cin:5 * Cin],
                   preferred_element_type=jnp.float32)                  # kh=1, kw in {0,1}
    acc += jnp.dot(tap(x_cur, 1, 1, Cin), w_ref[5 * Cin:6 * Cin],
                   preferred_element_type=jnp.float32)                  # kh=1, kw=2
    acc += jnp.dot(tap(x_nxt, 0, 0, C2), w_ref[6 * Cin:8 * Cin],
                   preferred_element_type=jnp.float32)                  # kh=2, kw in {0,1}
    acc += jnp.dot(tap(x_nxt, 0, 1, Cin), w_ref[8 * Cin:9 * Cin],
                   preferred_element_type=jnp.float32)                  # kh=2, kw=2

    y = acc + b_ref[...]                                                # folded BN bias (f32)
    y = jnp.where(y >= 0, y, NEG_SLOPE * y)                             # LeakyReLU(0.1)
    o_ref[0] = y.astype(o_ref.dtype)                                    # bf16 store


def _pick_row_block(OH, OW, in_row_bytes, out_row_bytes, budget):
    """Largest divisor TR of OH whose double-buffered blocks fit `budget` bytes."""
    smallest_valid = OH
    for TR in range(OH, 0, -1):
        if OH % TR:
            continue
        if TR != OH and (TR * OW) % 8:        # keep the output block sublane-friendly
            continue
        smallest_valid = TR
        if 2 * TR * (in_row_bytes + out_row_bytes) <= budget:
            return TR
    return smallest_valid


def down_block_nhwc(x_nhwc, weight_hwio, gamma, beta, running_mean, running_var,
                    *, row_block=None, vmem_budget_bytes=12 * 2**20):
    """DownBlock forward in NHWC (preferred entry point for an NHWC/bf16 network).

    x_nhwc:      (N, H, W, Cin)
    weight_hwio: (3, 3, Cin, Cout)   (== torch conv weight.permute(2, 3, 1, 0))
    Returns (N, OH, OW, Cout) in bf16.
    """
    N, H, W, Cin = x_nhwc.shape
    KH, KW, Cin_w, Cout = weight_hwio.shape
    assert (KH, KW) == (3, 3) and Cin_w == Cin
    stride, pad = 2, 1
    OH = (H + 2 * pad - KH) // stride + 1
    OW = (W + 2 * pad - KW) // stride + 1

    # Lane-dense output only when the padding overhead is small (<= 2x); at tiny Cout
    # the masked-store penalty is far cheaper than the extra HBM bytes.
    Coutp = _round_up(Cout, 128) if Cout >= 64 else Cout

    # ---- parity-fold the stride-2 grid with a FREE reshape (no im2col, no transpose):
    #      x4[n, a, ph*W1 + b, pw*Cin + c] == x_padded[n, 2a+ph, 2b+pw, c]
    W1 = OW + 1                       # (could round to 8 for aligned col starts at the
    Hp, Wp = 2 * (OH + 1), 2 * W1     #  cost of extra padded DMA bytes — bytes win here)
    x = x_nhwc.astype(jnp.bfloat16)
    xp = jnp.pad(x, ((0, 0), (pad, Hp - pad - H), (pad, Wp - pad - W), (0, 0)))
    x4 = xp.reshape(N, OH + 1, 2 * W1, 2 * Cin)

    # ---- fold eval-mode BatchNorm: scale into the weights, bias kept for the kernel.
    scale = (gamma / jnp.sqrt(running_var + BN_EPS)).astype(jnp.float32)
    bias = (beta - running_mean * scale).astype(jnp.float32)
    wf = weight_hwio.astype(jnp.float32) * scale[None, None, None, :]
    wf = jnp.pad(wf, ((0, 0), (0, 0), (0, 0), (0, Coutp - Cout)))
    # Pack per merged tap group: for each kh -> [kw=0|1 as one (2*Cin) slab, then kw=2].
    w_packed = jnp.concatenate(
        [jnp.concatenate([wf[kh, 0:2].reshape(2 * Cin, Coutp), wf[kh, 2]], axis=0)
         for kh in range(3)], axis=0).astype(jnp.bfloat16)                # (9*Cin, Coutp)
    b2 = jnp.pad(bias, (0, Coutp - Cout)).reshape(1, Coutp)

    # ---- output-row block: largest divisor of OH that keeps double-buffered blocks
    # inside the default scoped VMEM of v5e/v6e/v7x.
    in_row_bytes = 2 * W1 * 2 * Cin * 2          # bf16 input row of x4
    out_row_bytes = OW * Coutp * 2               # bf16 output row
    if row_block is None:
        TR = _pick_row_block(OH, OW, in_row_bytes, out_row_bytes, vmem_budget_bytes)
    else:
        TR = row_block
        assert OH % TR == 0 and (TR == OH or (TR * OW) % 8 == 0), (OH, OW, TR)
    R = OH // TR

    kernel = functools.partial(_downblock_kernel, TR=TR, OW=OW, W1=W1, Cin=Cin)
    out = pl.pallas_call(
        kernel,
        out_shape=jax.ShapeDtypeStruct((N, OH * OW, Coutp), jnp.bfloat16),
        grid=(N, R),
        in_specs=[
            # main rows [r*TR, r*TR+TR)
            pl.BlockSpec((1, TR, 2 * W1, 2 * Cin), lambda n, r: (n, r, 0, 0)),
            # +1 halo row r*TR+TR (same array, 1-row blocks -> block index == row index)
            pl.BlockSpec((1, 1, 2 * W1, 2 * Cin), lambda n, r: (n, r * TR + TR, 0, 0)),
            pl.BlockSpec((9 * Cin, Coutp), lambda n, r: (0, 0)),   # weights (grid-invariant)
            pl.BlockSpec((1, Coutp), lambda n, r: (0, 0)),         # bias    (grid-invariant)
        ],
        out_specs=pl.BlockSpec((1, TR * OW, Coutp), lambda n, r: (n, r, 0)),
        compiler_params=pltpu.CompilerParams(
            dimension_semantics=("parallel", "parallel"),
            vmem_limit_bytes=32 * 2**20),
    )(x4, x4, w_packed, b2)

    out = out.reshape(N, OH, OW, Coutp)          # free metadata reshape
    return out if Coutp == Cout else out[..., :Cout]


def down_block(x_nchw, weight_hwio, gamma, beta, running_mean, running_var, *, row_block=None):
    """NCHW adapter matching the PyTorch module interface (use down_block_nhwc in an
    NHWC/bf16 network to avoid the layout round trips)."""
    x = jnp.transpose(x_nchw, (0, 2, 3, 1))
    y = down_block_nhwc(x, weight_hwio, gamma, beta, running_mean, running_var,
                        row_block=row_block)
    return jnp.transpose(y, (0, 3, 1, 2))


def _reference(x_nchw, weight_hwio, gamma, beta, running_mean, running_var):
    """Pure-JAX f32 reference matching the PyTorch semantics."""
    w_oihw = jnp.transpose(weight_hwio, (3, 2, 0, 1))
    y = jax.lax.conv_general_dilated(
        x_nchw.astype(jnp.float32), w_oihw.astype(jnp.float32),
        window_strides=(2, 2), padding=((1, 1), (1, 1)),
        dimension_numbers=("NCHW", "OIHW", "NCHW"))
    scale = (gamma / jnp.sqrt(running_var + BN_EPS)).reshape(1, -1, 1, 1)
    bias = (beta - running_mean * gamma / jnp.sqrt(running_var + BN_EPS)).reshape(1, -1, 1, 1)
    y = y * scale + bias
    return jnp.where(y >= 0, y, NEG_SLOPE * y)


if __name__ == "__main__":
    # DownBlock(8): in_channels = 8 // 2 = 4, out_channels = 8
    N, Cin, Cout, H, W = 2, 4, 8, 16, 16

    key = jax.random.PRNGKey(0)
    k_x, k_w, k_g, k_b, k_m, k_v = jax.random.split(key, 6)

    x = jax.random.normal(k_x, (N, Cin, H, W), dtype=jnp.float32)
    weight = jax.random.normal(k_w, (3, 3, Cin, Cout), dtype=jnp.float32) * 0.1
    gamma = 1.0 + 0.1 * jax.random.normal(k_g, (Cout,), dtype=jnp.float32)
    beta = 0.1 * jax.random.normal(k_b, (Cout,), dtype=jnp.float32)
    running_mean = 0.1 * jax.random.normal(k_m, (Cout,), dtype=jnp.float32)
    running_var = jnp.abs(1.0 + 0.1 * jax.random.normal(k_v, (Cout,), dtype=jnp.float32))

    y_ref = _reference(x, weight, gamma, beta, running_mean, running_var)

    # Run twice: whole-image row block (auto) and 2 row blocks (exercises the halo path).
    for rb in (None, 4):
        y = jax.block_until_ready(
            down_block(x, weight, gamma, beta, running_mean, running_var, row_block=rb))
        assert y.shape == (N, Cout, H // 2, W // 2), y.shape
        # bf16 MXU operands + bf16 output vs f32 reference -> bf16-level tolerance.
        err = float(jnp.max(jnp.abs(y.astype(jnp.float32) - y_ref)))
        assert err < 6e-2, (rb, err)

    print("KERNEL_OK")
</pallas_src>

<mosaic_0001>
module attributes {stable_mosaic.version = 11 : i64} {
  func.func @_downblock_kernel(%arg0: i32, %arg1: i32, %arg2: memref<1x8x18x8xbf16, #tpu.memory_space<vmem>>, %arg3: memref<1x1x18x8xbf16, #tpu.memory_space<vmem>>, %arg4: memref<36x8xbf16, #tpu.memory_space<vmem>>, %arg5: memref<1x8xf32, #tpu.memory_space<vmem>>, %arg6: memref<1x64x8xbf16, #tpu.memory_space<vmem>>) attributes {dimension_semantics = [#tpu.dimension_semantics<parallel>, #tpu.dimension_semantics<parallel>], iteration_bounds = array<i64: 2, 1>, scalar_prefetch = 0 : i64, scratch_operands = 0 : i64, tpu.core_type = #tpu.core_type<tc>, window_params = [{transform_indices = @transform_0, window_bounds = array<i64: 1, 8, 18, 8>}, {transform_indices = @transform_1, window_bounds = array<i64: 1, 1, 18, 8>}, {pipeline_mode = #tpu.pipeline_mode<synchronous>, transform_indices = @transform_2, window_bounds = array<i64: 36, 8>}, {pipeline_mode = #tpu.pipeline_mode<synchronous>, transform_indices = @transform_3, window_bounds = array<i64: 1, 8>}, {transform_indices = @transform_4, window_bounds = array<i64: 1, 64, 8>}]} {
    %c0 = arith.constant 0 : index
    %c0_0 = arith.constant 0 : index
    %c0_1 = arith.constant 0 : index
    %c0_2 = arith.constant 0 : index
    %0 = vector.load %arg2[%c0, %c0_0, %c0_1, %c0_2] : memref<1x8x18x8xbf16, #tpu.memory_space<vmem>>, vector<1x8x18x8xbf16>
    %1 = vector.shape_cast %0 : vector<1x8x18x8xbf16> to vector<8x18x8xbf16>
    %c0_3 = arith.constant 0 : index
    %c1 = arith.constant 1 : index
    %c0_4 = arith.constant 0 : index
    %c0_5 = arith.constant 0 : index
    %2 = vector.load %arg2[%c0_3, %c1, %c0_4, %c0_5] : memref<1x8x18x8xbf16, #tpu.memory_space<vmem>>, vector<1x7x18x8xbf16>
    %3 = vector.shape_cast %2 : vector<1x7x18x8xbf16> to vector<7x18x8xbf16>
    %c0_6 = arith.constant 0 : index
    %c0_7 = arith.constant 0 : index
    %c0_8 = arith.constant 0 : index
    %c0_9 = arith.constant 0 : index
    %4 = vector.load %arg3[%c0_6, %c0_7, %c0_8, %c0_9] : memref<1x1x18x8xbf16, #tpu.memory_space<vmem>>, vector<1x1x18x8xbf16>
    %5 = vector.shape_cast %4 : vector<1x1x18x8xbf16> to vector<1x18x8xbf16>
    %6 = tpu.concatenate %3, %5 in 0 : vector<7x18x8xbf16>, vector<1x18x8xbf16> -> vector<8x18x8xbf16>
    %7 = vector.extract_strided_slice %1 {offsets = [0, 0, 0], sizes = [8, 8, 8], strides = [1, 1, 1]} : vector<8x18x8xbf16> to vector<8x8x8xbf16>
    %8 = vector.shape_cast %7 : vector<8x8x8xbf16> to vector<64x8xbf16>
    %c0_10 = arith.constant 0 : index
    %c0_11 = arith.constant 0 : index
    %9 = vector.load %arg4[%c0_10, %c0_11] : memref<36x8xbf16, #tpu.memory_space<vmem>>, vector<8x8xbf16>
    %cst = arith.constant dense<0.000000e+00> : vector<64x8xf32>
    %10 = tpu.matmul %8, %9, %cst {dimension_numbers = #tpu.dot_dimension_numbers<[1], [0], [0], [1], [0, 0, 1, 1], [], []>} : vector<64x8xbf16>, vector<8x8xbf16>, vector<64x8xf32> -> vector<64x8xf32>
    %11 = vector.extract_strided_slice %1 {offsets = [0, 1, 0], sizes = [8, 8, 4], strides = [1, 1, 1]} : vector<8x18x8xbf16> to vector<8x8x4xbf16>
    %12 = vector.shape_cast %11 : vector<8x8x4xbf16> to vector<64x4xbf16>
    %c8 = arith.constant 8 : index
    %c0_12 = arith.constant 0 : index
    %13 = vector.load %arg4[%c8, %c0_12] : memref<36x8xbf16, #tpu.memory_space<vmem>>, vector<4x8xbf16>
    %cst_13 = arith.constant dense<0.000000e+00> : vector<64x8xf32>
    %14 = tpu.matmul %12, %13, %cst_13 {dimension_numbers = #tpu.dot_dimension_numbers<[1], [0], [0], [1], [0, 0, 1, 1], [], []>} : vector<64x4xbf16>, vector<4x8xbf16>, vector<64x8xf32> -> vector<64x8xf32>
    %15 = arith.addf %10, %14 : vector<64x8xf32>
    %16 = vector.extract_strided_slice %1 {offsets = [0, 9, 0], sizes = [8, 8, 8], strides = [1, 1, 1]} : vector<8x18x8xbf16> to vector<8x8x8xbf16>
    %17 = vector.shape_cast %16 : vector<8x8x8xbf16> to vector<64x8xbf16>
    %c12 = arith.constant 12 : index
    %c0_14 = arith.constant 0 : index
    %18 = vector.load %arg4[%c12, %c0_14] : memref<36x8xbf16, #tpu.memory_space<vmem>>, vector<8x8xbf16>
    %cst_15 = arith.constant dense<0.000000e+00> : vector<64x8xf32>
    %19 = tpu.matmul %17, %18, %cst_15 {dimension_numbers = #tpu.dot_dimension_numbers<[1], [0], [0], [1], [0, 0, 1, 1], [], []>} : vector<64x8xbf16>, vector<8x8xbf16>, vector<64x8xf32> -> vector<64x8xf32>
    %20 = arith.addf %15, %19 : vector<64x8xf32>
    %21 = vector.extract_strided_slice %1 {offsets = [0, 10, 0], sizes = [8, 8, 4], strides = [1, 1, 1]} : vector<8x18x8xbf16> to vector<8x8x4xbf16>
    %22 = vector.shape_cast %21 : vector<8x8x4xbf16> to vector<64x4xbf16>
    %c20 = arith.constant 20 : index
    %c0_16 = arith.constant 0 : index
    %23 = vector.load %arg4[%c20, %c0_16] : memref<36x8xbf16, #tpu.memory_space<vmem>>, vector<4x8xbf16>
    %cst_17 = arith.constant dense<0.000000e+00> : vector<64x8xf32>
    %24 = tpu.matmul %22, %23, %cst_17 {dimension_numbers = #tpu.dot_dimension_numbers<[1], [0], [0], [1], [0, 0, 1, 1], [], []>} : vector<64x4xbf16>, vector<4x8xbf16>, vector<64x8xf32> -> vector<64x8xf32>
    %25 = arith.addf %20, %24 : vector<64x8xf32>
    %26 = vector.extract_strided_slice %6 {offsets = [0, 0, 0], sizes = [8, 8, 8], strides = [1, 1, 1]} : vector<8x18x8xbf16> to vector<8x8x8xbf16>
    %27 = vector.shape_cast %26 : vector<8x8x8xbf16> to vector<64x8xbf16>
    %c24 = arith.constant 24 : index
    %c0_18 = arith.constant 0 : index
    %28 = vector.load %arg4[%c24, %c0_18] : memref<36x8xbf16, #tpu.memory_space<vmem>>, vector<8x8xbf16>
    %cst_19 = arith.constant dense<0.000000e+00> : vector<64x8xf32>
    %29 = tpu.matmul %27, %28, %cst_19 {dimension_numbers = #tpu.dot_dimension_numbers<[1], [0], [0], [1], [0, 0, 1, 1], [], []>} : vector<64x8xbf16>, vector<8x8xbf16>, vector<64x8xf32> -> vector<64x8xf32>
    %30 = arith.addf %25, %29 : vector<64x8xf32>
    %31 = vector.extract_strided_slice %6 {offsets = [0, 1, 0], sizes = [8, 8, 4], strides = [1, 1, 1]} : vector<8x18x8xbf16> to vector<8x8x4xbf16>
    %32 = vector.shape_cast %31 : vector<8x8x4xbf16> to vector<64x4xbf16>
    %c32 = arith.constant 32 : index
    %c0_20 = arith.constant 0 : index
    %33 = vector.load %arg4[%c32, %c0_20] : memref<36x8xbf16, #tpu.memory_space<vmem>>, vector<4x8xbf16>
    %cst_21 = arith.constant dense<0.000000e+00> : vector<64x8xf32>
    %34 = tpu.matmul %32, %33, %cst_21 {dimension_numbers = #tpu.dot_dimension_numbers<[1], [0], [0], [1], [0, 0, 1, 1], [], []>} : vector<64x4xbf16>, vector<4x8xbf16>, vector<64x8xf32> -> vector<64x8xf32>
    %35 = arith.addf %30, %34 : vector<64x8xf32>
    %c0_22 = arith.constant 0 : index
    %c0_23 = arith.constant 0 : index
    %36 = vector.load %arg5[%c0_22, %c0_23] : memref<1x8xf32, #tpu.memory_space<vmem>>, vector<1x8xf32>
    %37 = vector.broadcast %36 : vector<1x8xf32> to vector<64x8xf32>
    %38 = arith.addf %35, %37 : vector<64x8xf32>
    %cst_24 = arith.constant 0.000000e+00 : f32
    %39 = vector.broadcast %cst_24 : f32 to vector<64x8xf32>
    %40 = arith.cmpf oge, %38, %39 : vector<64x8xf32>
    %cst_25 = arith.constant 1.000000e-01 : f32
    %41 = vector.broadcast %cst_25 : f32 to vector<64x8xf32>
    %42 = arith.mulf %41, %38 : vector<64x8xf32>
    %43 = arith.select %40, %38, %42 : vector<64x8xi1>, vector<64x8xf32>
    %44 = arith.truncf %43 : vector<64x8xf32> to vector<64x8xbf16>
    %c0_26 = arith.constant 0 : index
    %c0_27 = arith.constant 0 : index
    %c0_28 = arith.constant 0 : index
    %45 = vector.load %arg6[%c0_26, %c0_27, %c0_28] : memref<1x64x8xbf16, #tpu.memory_space<vmem>>, vector<1x64x8xbf16>
    %46 = vector.shape_cast %45 : vector<1x64x8xbf16> to vector<64x8xbf16>
    %47 = vector.shape_cast %44 : vector<64x8xbf16> to vector<1x64x8xbf16>
    tpu.vector_store %arg6[%c0_26, %c0_27, %c0_28], %47 {strides = array<i32>} : memref<1x64x8xbf16, #tpu.memory_space<vmem>>, vector<1x64x8xbf16>,
    return
  }
  func.func @transform_0(%arg0: i32, %arg1: i32) -> (i32, i32, i32, i32) {
    %c0_i32 = arith.constant 0 : i32
    %c0_i32_0 = arith.constant 0 : i32
    %c0_i32_1 = arith.constant 0 : i32
    return %arg0, %arg1, %c0_i32, %c0_i32_0 : i32, i32, i32, i32
  }
  func.func @transform_1(%arg0: i32, %arg1: i32) -> (i32, i32, i32, i32) {
    %c8_i32 = arith.constant 8 : i32
    %0 = arith.muli %arg1, %c8_i32 : i32
    %c8_i32_0 = arith.constant 8 : i32
    %1 = arith.addi %0, %c8_i32_0 : i32
    %c0_i32 = arith.constant 0 : i32
    %c0_i32_1 = arith.constant 0 : i32
    %c0_i32_2 = arith.constant 0 : i32
    return %arg0, %1, %c0_i32, %c0_i32_1 : i32, i32, i32, i32
  }
  func.func @transform_2(%arg0: i32, %arg1: i32) -> (i32, i32) {
    %c0_i32 = arith.constant 0 : i32
    %c0_i32_0 = arith.constant 0 : i32
    %c0_i32_1 = arith.constant 0 : i32
    return %c0_i32, %c0_i32_0 : i32, i32
  }
  func.func @transform_3(%arg0: i32, %arg1: i32) -> (i32, i32) {
    %c0_i32 = arith.constant 0 : i32
    %c0_i32_0 = arith.constant 0 : i32
    %c0_i32_1 = arith.constant 0 : i32
    return %c0_i32, %c0_i32_0 : i32, i32
  }
  func.func @transform_4(%arg0: i32, %arg1: i32) -> (i32, i32, i32) {
    %c0_i32 = arith.constant 0 : i32
    %c0_i32_0 = arith.constant 0 : i32
    return %arg0, %arg1, %c0_i32 : i32, i32, i32
  }
}

</mosaic_0001>

<bundles_post_ra>
// kernel: tpu_custom_call.1
= control target key start
LH: loop header
LB: loop body
LE: loop exit
PB: predicated region body
PF: predicated region fallthrough
CT: control target
= control target key end

     0   :  { %s1809_s15 = smov 0   ;;  %s1811_s16 = smov 0   ;;  %s2167_s0 = inlined_call_operand.vmem [shape: bf16[2,9,18,8], index: 0, kind: input, shape index: {}]   ;;  %s2168_s1 = inlined_call_operand.vmem [shape: bf16[2,9,18,8], index: 1, kind: input, shape index: {}]   ;;  %s2169_s2 = inlined_call_operand.vmem [shape: bf16[36,8], index: 2, kind: input, shape index: {}]   ;;  %s2170_s3 = inlined_call_operand.vmem [shape: f32[1,8], index: 3, kind: input, shape index: {}]   ;;  %s2171_s4 = inlined_call_operand.vmem [shape: bf16[2,64,8], index: 4, kind: output, shape index: {}]  }
   0x1   :  { %s1813_s17 = smov 0  }
   0x2 LB: > { %s26_s18 = sadd.s32 1, %s1778_s16  ;;  %p1529_p0 = scmp.ge.s32.totalorder %s1782_s17, 1  ;;  %s1782_s17 = sphi %s1813_s17, %s14_s17   ;;  %s1778_s16 = sphi %s1811_s16, %s2177_s16   ;;  %s1774_s15 = sphi %s1809_s15, %s2176_s15  }
   0x3   : > { %p28_p1 = scmp.ge.s32.totalorder %s26_s18, 2  ;;  %p218_p2 = scmp.lt.s32.totalorder %s1782_s17, 3 }
   0x5   : > { %s2179_s18 = smov (%p28_p1, %s26_s18), 0  ;;  %p219_p3 = pnand %p1529_p0, %p218_p2 }
   0x6   : > { %p275_p4 = scmp.lt.s32.totalorder (!%p219_p3), %s1774_s15, 1 }
   0x7   : > { %222 = sbr.rel (%p219_p3) target bundleno = 297 (0x129), region = 36 }
   0xc   : > { %v355_v0 = vld [vmem:[%s2169_s2] sm:$0xf]  ;;  %vm599_vm0 = vcmask 1043456   ;;  %v471_v1 = vld [vmem:[%s2169_s2 + $0x4] sm:$0x3]  ;;  %vm497_vm1 = vcmask 1041408  }
   0xd   : > { %1719 = vmatprep.subr.msk.bf16.mxu1 %vm599_vm0, %v355_v0  ;;  %v601_v2 = vsel %vm599_vm0, %v355_v0, 0  ;;  %1718 = vmatprep.subr.msk.bf16.mxu0 %vm497_vm1, %v471_v1  ;;  %v499_v3 = vsel %vm497_vm1, %v471_v1, 0  ;;  %s2181_s15 = smov (!%p275_p4, %s1774_s15), 1  ;;  %v1753_v4 = vld [vmem:[%s2169_s2 + $0x4] sm:$0x3c]   ;;  %vm586_vm2 = vcmask 64512  }
   0xe   : > { %1669 = vmatpush3.bf16.msra.mxu1 %v601_v2  ;;  %1659 = vmatpush3.bf16.msra.mxu0 %v499_v3  ;;  %v1845_v5 = vld [vmem:[%s2169_s2 + $0x8] ss:$0 sps:$4 sm:$0xcc]   ;;  %s1724_s27 = smul.u32 108, %s2181_s15  ;;  %v767_v6 = vrot.slane %v1753_v4, 2  ;;  %vm484_vm5 = vcmask 31744  }
   0xf   : > { %v1851_v7 = vld [vmem:[%s2169_s2 + $0xc] sm:$0xf]  ;;  %v1856_v8 = vld [vmem:[%s2169_s2 + $0x10] sm:$0x3]  ;;  %vm356_vm3 = vsmask.f32 3328 }
  0x10   : > { %v923_v9 = vrot.slane %v1845_v5, 2  ;;  %s1864_s8 = scalar_lea.vmem %s2167_s0, %s1724_s27  ;;  %vm357_vm4 = vsmask.f32 7440  ;;  %1720 = vmatprep.subr.msk.bf16.mxu0 %vm599_vm0, %v767_v6  ;;  %v1868_v10 = vsel %vm599_vm0, %v767_v6, 0  ;;  %v1872_v11 = vsel %vm599_vm0, %v1851_v7, 0  ;;  %s1618_s9 = sadd.s32 96, %s1724_s27 }
  0x11   : > { %v1876_v12 = vsel %vm497_vm1, %v1856_v8, 0  ;;  %v314_v13 = vld [vmem:[%s1864_s8] sm:$0xf]  ;;  %v317_v14 = vld [vmem:[%s1864_s8 + $0xc] sm:$0xf]  ;;  %vm1895_vm6 = vmor %vm356_vm3, %vm357_vm4  ;;  %vm872_vm7 = vcmask 1042432   ;;  %s300_s12 = scalar_lea.vmem %s2168_s1, %s1618_s9 }
  0x12   : > { %v320_v15 = vld [vmem:[%s1864_s8 + $0x18] sm:$0xf]  ;;  %1721 = vmatprep.subr.msk.bf16.mxu1 %vm497_vm1, %v923_v9  ;;  %v360_v16 = vshrl.u32 %v314_v13, 16  ;;  %v363_v17 = vshll.u32 %v314_v13, 16  ;;  %v374_v18 = vshrl.u32 %v317_v14, 16  ;;  %v377_v19 = vshll.u32 %v317_v14, 16 }
  0x13   : > { %v323_v20 = vld [vmem:[%s1864_s8 + $0x24] sm:$0xf]  ;;  %v1556_v21 = vcombine.low %v314_v13, %v317_v14  ;;  %v388_v22 = vshrl.u32 %v320_v15, 16  ;;  %v391_v23 = vshll.u32 %v320_v15, 16  ;;  %v1889_v30 = vld [vmem:[%s1864_s8 + $0x10] sm:$0xf] }
  0x14   : > { %v402_v24 = vshrl.u32 %v323_v20, 16  ;;  %v1886_v25 = vld [vmem:[%s1864_s8 + $0x4] sm:$0xf]  ;;  %v362_v26 = vrot.slane %v360_v16, 4  ;;  %v365_v27 = vrot.slane %v363_v17, 5  ;;  %v376_v28 = vrot.slane %v374_v18, 4 }
  0x15   : > { %v379_v29 = vrot.slane %v377_v19, 5  ;;  %1670 = vmatprep.mubr.msk.bf16.mxu1 %vm586_vm2, %v1556_v21  ;;  %v390_v31 = vrot.slane %v388_v22, 4  ;;  %v393_v32 = vrot.slane %v391_v23, 5  ;;  %v405_v34 = vshll.u32 %v323_v20, 16  ;;  %v1903_v44 = vld [vmem:[%s1864_s8 + $0x1c] sm:$0xf] }
  0x16   : > { %v404_v33 = vrot.slane %v402_v24, 4  ;;  %v1557_v35 = vcombine.low %v320_v15, %v323_v20  ;;  %v366_v36 = vor.u32 %v365_v27, %v362_v26  ;;  %v369_v37 = vshll.u32 %v1886_v25, 16  ;;  %v1908_v49 = vld [vmem:[%s1864_s8 + $0x28] sm:$0xf]  ;;  %v326_v2 = vld [vmem:[%s1864_s8 + $0x30] sm:$0xf] }
  0x17   : > { %v380_v38 = vor.u32 %v379_v29, %v376_v28  ;;  %v407_v39 = vrot.slane %v405_v34, 5  ;;  %v383_v41 = vshll.u32 %v1889_v30, 16  ;;  %v668_v42 = vshrl.u32 %v1886_v25, 16  ;;  %v329_v14 = vld [vmem:[%s1864_s8 + $0x3c] sm:$0xf]  ;;  %s1619_s19 = sshll.u32 %s2181_s15, 5 }
  0x18   : > { %v678_v43 = vshrl.u32 %v1889_v30, 16  ;;  %1671 = vmatmul.mubr.msk.bf16.vlgmr.msra.gmra.mxu1 %vm586_vm2, %v1557_v35  ;;  %v367_v45 = vrot.slane %v366_v36, 4  ;;  %v371_v46 = vrot.slane %v369_v37, 5  ;;  %v1573_v48 = vrot.slane %v1886_v25, 9  ;;  %v332_v23 = vld [vmem:[%s1864_s8 + $0x48] sm:$0xf]  ;;  %s2133_s22 = scalar_lea.vmem %s2171_s4, %s1619_s19 }
  0x19   : > { %v381_v47 = vrot.slane %v380_v38, 4  ;;  %v385_v50 = vrot.slane %v383_v41, 5  ;;  %v670_v51 = vrot.slane %v668_v42, 4  ;;  %v1574_v53 = vrot.slane %v1889_v30, 9  ;;  %v335_v29 = vld [vmem:[%s1864_s8 + $0x54] sm:$0xf] }
  0x1a   : > { %v680_v52 = vrot.slane %v678_v43, 4  ;;  %v372_v54 = vsel %vm1895_vm6, %v367_v45, %v371_v46  ;;  %v394_v55 = vor.u32 %v393_v32, %v390_v31  ;;  %v397_v56 = vshll.u32 %v1903_v44, 16  ;;  %v1938_v35 = vld [vmem:[%s1864_s8 + $0x34] sm:$0xf]  ;;  %v1944_v38 = vld [vmem:[%s1864_s8 + $0x40] sm:$0xf] }
  0x1b   : > { %v408_v57 = vor.u32 %v407_v39, %v404_v33  ;;  %v386_v58 = vsel %vm1895_vm6, %v381_v47, %v385_v50  ;;  %v671_v59 = vor.u32 %v670_v51, %v371_v46  ;;  %v411_v61 = vshll.u32 %v1908_v49, 16  ;;  %v1956_v51 = vld [vmem:[%s1864_s8 + $0x58] sm:$0xf] }
  0x1c   : > { %v681_v60 = vor.u32 %v680_v52, %v385_v50  ;;  %v1548_v62 = vcombine.low %v372_v54, %v386_v58  ;;  %v395_v63 = vrot.slane %v394_v55, 4  ;;  %v399_v0 = vrot.slane %v397_v56, 5  ;;  %v316_v56 = vld [vmem:[%s1864_s8 + $0x8] sm:$0x1] }
  0x1d   : > { %v409_v1 = vrot.slane %v408_v57, 4  ;;  %v1918_v3 = vrot.slane %v671_v59, 4  ;;  %v413_v6 = vrot.slane %v411_v61, 5  ;;  %v688_v13 = vshrl.u32 %v1903_v44, 16  ;;  %v319_v61 = vld [vmem:[%s1864_s8 + $0x14] sm:$0x1] }
  0x1e   : > { %v1920_v4 = vrot.slane %v681_v60, 4  ;;  %vm873_vm8 = vcmask 1046532   ;;  %1660 = vmatprep.mubr.msk.bf16.mxu0 %vm484_vm5, %v1548_v62  ;;  %v400_v15 = vsel %vm1895_vm6, %v395_v63, %v399_v0  ;;  %v698_v16 = vshrl.u32 %v1908_v49, 16 }
  0x1f   : > { %v1575_v17 = vrot.slane %v1903_v44, 9  ;;  %v1576_v18 = vrot.slane %v1908_v49, 9  ;;  %v414_v19 = vsel %vm1895_vm6, %v409_v1, %v413_v6  ;;  %v690_v20 = vrot.slane %v688_v13, 4  ;;  %v322_v1 = vld [vmem:[%s1864_s8 + $0x20] sm:$0x1]  ;;  %vm1976_vm9 = vmor %vm872_vm7, %vm873_vm8 }
  0x20   : > { %v937_v21 = vsel %vm497_vm1, %v923_v9, 0  ;;  %v416_v22 = vshrl.u32 %v326_v2, 16  ;;  %v1549_v24 = vcombine.low %v400_v15, %v414_v19  ;;  %v700_v26 = vrot.slane %v698_v16, 4  ;;  %v325_v16 = vld [vmem:[%s1864_s8 + $0x2c] sm:$0x1] }
  0x21   : > { %1689 = vmatpush3.bf16.msra.mxu1 %v937_v21  ;;  %v419_v27 = vshll.u32 %v326_v2, 16  ;;  %v430_v28 = vshrl.u32 %v329_v14, 16  ;;  %v691_v31 = vor.u32 %v690_v20, %v399_v0  ;;  %v433_v33 = vshll.u32 %v329_v14, 16 }
  0x22   : > { %v418_v32 = vrot.slane %v416_v22, 4  ;;  %v1558_v34 = vcombine.low %v326_v2, %v329_v14  ;;  %1723 = vmatprep.subr.msk.bf16.mxu1 %vm497_vm1, %v1856_v8  ;;  %1661 = vmatmul.mubr.msk.bf16.vlgmr.msra.gmra.mxu0 %vm484_vm5, %v1549_v24  ;;  %v701_v5 = vor.u32 %v700_v26, %v413_v6  ;;  %v444_v37 = vshrl.u32 %v332_v23, 16  ;;  %v1951_v8 = vld [vmem:[%s1864_s8 + $0x4c] sm:$0xf] }
  0x23   : > { %v421_v9 = vrot.slane %v419_v27, 5  ;;  %v432_v36 = vrot.slane %v430_v28, 4  ;;  %v1946_v39 = vrot.slane %v691_v31, 4  ;;  %1679 = vmatpush3.bf16.msra.mxu0 %v1868_v10  ;;  %v435_v41 = vrot.slane %v433_v33, 5 }
  0x24   : > { %1674 = vmatprep.mubr.msk.bf16.mxu1 %vm586_vm2, %v1558_v34  ;;  %v447_v42 = vshll.u32 %v332_v23, 16  ;;  %v458_v43 = vshrl.u32 %v335_v29, 16  ;;  %v1953_v45 = vrot.slane %v701_v5, 4  ;;  %v446_v46 = vrot.slane %v444_v37, 4  ;;  %1722 = vmatprep.subr.msk.bf16.mxu0 %vm599_vm0, %v1851_v7 }
  0x25   : > { %v461_v47 = vshll.u32 %v335_v29, 16  ;;  %v1559_v50 = vcombine.low %v332_v23, %v335_v29  ;;  %v422_v54 = vor.u32 %v421_v9, %v418_v32  ;;  %v425_v55 = vshll.u32 %v1938_v35, 16  ;;  %v328_v9 = vld [vmem:[%s1864_s8 + $0x38] sm:$0x1] }
  0x26   : > { %v449_v10 = vrot.slane %v447_v42, 5  ;;  %v460_v52 = vrot.slane %v458_v43, 4  ;;  %v436_v58 = vor.u32 %v435_v41, %v432_v36  ;;  %v439_v59 = vshll.u32 %v1944_v38, 16  ;;  %v331_v41 = vld [vmem:[%s1864_s8 + $0x44] sm:$0x1] }
  0x27   : > { %v463_v57 = vrot.slane %v461_v47, 5  ;;  %1675 = vmatmul.mubr.msk.bf16.gmra.mxu1 %vm586_vm2, %v1559_v50  ;;  %v453_v60 = vshll.u32 %v1951_v8, 16  ;;  %v423_v62 = vrot.slane %v422_v54, 4  ;;  %v1966_v63 = vrot.slane %v425_v55, 5 }
  0x28   : > { %v450_v7 = vor.u32 %v449_v10, %v446_v46  ;;  %v467_v0 = vshll.u32 %v1956_v51, 16  ;;  %v437_v2 = vrot.slane %v436_v58, 4  ;;  %v1970_v6 = vrot.slane %v439_v59, 5  ;;  %v334_v46 = vld [vmem:[%s1864_s8 + $0x50] sm:$0x1] }
  0x29   : > { %v1972_v13 = vrot.slane %v453_v60, 5  ;;  %v464_v14 = vor.u32 %v463_v57, %v460_v52  ;;  %v428_v19 = vsel %vm1895_vm6, %v423_v62, %v1966_v63  ;;  %v877_v22 = vrot.slane %v316_v56, 5  ;;  %v337_v57 = vld [vmem:[%s1864_s8 + $0x5c] sm:$0x1] }
  0x2a   : > { %v451_v20 = vrot.slane %v450_v7, 4  ;;  %v1984_v21 = vrot.slane %v467_v0, 5  ;;  %v442_v23 = vsel %vm1895_vm6, %v437_v2, %v1970_v6  ;;  %v881_v26 = vrot.slane %v319_v61, 5 }
  0x2b   : > { %v465_v24 = vrot.slane %v464_v14, 4  ;;  %v885_v27 = vrot.slane %v322_v1, 5  ;;  %v1550_v28 = vcombine.low %v428_v19, %v442_v23  ;;  %v878_v31 = vsel %vm1976_vm9, %v1573_v48, %v877_v22  ;;  %v2049_v22 = vld [vmem:[%s1864_s8 + $0xc] sm:$0xf] }
  0x2c   : > { %v456_v29 = vsel %vm1895_vm6, %v451_v20, %v1972_v13  ;;  %v889_v32 = vrot.slane %v325_v16, 5  ;;  %v882_v34 = vsel %vm1976_vm9, %v1574_v53, %v881_v26  ;;  %v674_v25 = vshll.u32 %v316_v56, 16 }
  0x2d   : > { %v470_v33 = vsel %vm1895_vm6, %v465_v24, %v1984_v21  ;;  %v886_v5 = vsel %vm1976_vm9, %v1575_v17, %v885_v27  ;;  %1664 = vmatprep.mubr.msk.bf16.mxu0 %vm484_vm5, %v1550_v28  ;;  %v1581_v36 = vcombine.low %v878_v31, %v882_v34  ;;  %v684_v30 = vshll.u32 %v319_v61, 16  ;;  %v1535_v27 = vld [vmem:[%s1864_s8 + $0x10] sm:$0xf]  ;;  %v1536_v34 = vld [vmem:[%s1864_s8 + $0x18] sm:$0xf] }
  0x2e   : > { %v1551_v48 = vcombine.low %v456_v29, %v470_v33  ;;  %v890_v37 = vsel %vm1976_vm9, %v1576_v18, %v889_v32  ;;  %v676_v53 = vrot.slane %v674_v25, 5  ;;  %v694_v43 = vshll.u32 %v322_v1, 16 }
  0x2f   : > { %v1582_v42 = vcombine.low %v886_v5, %v890_v37  ;;  %v704_v44 = vshll.u32 %v325_v16, 16  ;;  %1690 = vmatprep.mubr.msk.bf16.mxu1 %vm484_vm5, %v1581_v36  ;;  %v686_v17 = vrot.slane %v684_v30, 5  ;;  %v1577_v47 = vrot.slane %v1938_v35, 9 }
  0x30   : > { %1665 = vmatmul.mubr.msk.bf16.gmra.mxu0 %vm484_vm5, %v1551_v48  ;;  %v893_v50 = vrot.slane %v328_v9, 5  ;;  %v1578_v49 = vrot.slane %v1944_v38, 9  ;;  %v677_v18 = vsel %vm1895_vm6, %v1918_v3, %v676_v53  ;;  %v696_v10 = vrot.slane %v694_v43, 5  ;;  %v2066_v53 = vld [vmem:[%s1864_s8 + $0x24] sm:$0xf] }
  0x31   : > { %1691 = vmatmul.mubr.msk.bf16.vlgmr.msra.gmra.mxu1 %vm484_vm5, %v1582_v42  ;;  %v706_v52 = vrot.slane %v704_v44, 5  ;;  %v897_v54 = vrot.slane %v331_v41, 5  ;;  %v687_v55 = vsel %vm1895_vm6, %v1920_v4, %v686_v17  ;;  %v1579_v58 = vrot.slane %v1951_v8, 9 }
  0x32   : > { %1709 = vmatpush3.bf16.msra.mxu1 %v1876_v12  ;;  %v894_v56 = vsel %vm1976_vm9, %v1577_v47, %v893_v50  ;;  %v901_v59 = vrot.slane %v334_v46, 5  ;;  %v1564_v60 = vcombine.low %v677_v18, %v687_v55  ;;  %v697_v3 = vsel %vm1895_vm6, %v1946_v39, %v696_v10  ;;  %v1540_v18 = vld [vmem:[%s1864_s8 + $0x30] sm:$0xf] }
  0x33   : > { %v707_v61 = vsel %vm1895_vm6, %v1953_v45, %v706_v52  ;;  %v898_v12 = vsel %vm1976_vm9, %v1578_v49, %v897_v54  ;;  %v1580_v0 = vrot.slane %v1956_v51, 9  ;;  %v905_v1 = vrot.slane %v337_v57, 5  ;;  %v1539_v49 = vld [vmem:[%s1864_s8 + $0x28] sm:$0xf] }
  0x34   : > { %v1565_v4 = vcombine.low %v697_v3, %v707_v61  ;;  %v1583_v62 = vcombine.low %v894_v56, %v898_v12  ;;  %v902_v7 = vsel %vm1976_vm9, %v1579_v58, %v901_v59  ;;  %1680 = vmatprep.mubr.msk.bf16.mxu0 %vm586_vm2, %v1564_v60  ;;  %v708_v39 = vshrl.u32 %v1938_v35, 16  ;;  %v1541_v59 = vld [vmem:[%s1864_s8 + $0x34] sm:$0xf] }
  0x35   : > { %v714_v2 = vshll.u32 %v328_v9, 16  ;;  %v718_v45 = vshrl.u32 %v1944_v38, 16  ;;  %v724_v14 = vshll.u32 %v331_v41, 16  ;;  %v728_v16 = vshrl.u32 %v1951_v8, 16 }
  0x36   : > { %1694 = vmatprep.mubr.msk.bf16.mxu1 %vm484_vm5, %v1583_v62  ;;  %v734_v19 = vshll.u32 %v334_v46, 16  ;;  %v738_v20 = vshrl.u32 %v1956_v51, 16  ;;  %v906_v23 = vsel %vm1976_vm9, %v1580_v0, %v905_v1  ;;  %v710_v24 = vrot.slane %v708_v39, 4  ;;  %v1542_v39 = vld [vmem:[%s1864_s8 + $0x3c] sm:$0xf] }
  0x37   : > { %v716_v26 = vrot.slane %v714_v2, 5  ;;  %v720_v35 = vrot.slane %v718_v45, 4  ;;  %v1584_v38 = vcombine.low %v902_v7, %v906_v23  ;;  %v726_v28 = vrot.slane %v724_v14, 5  ;;  %v1543_v2 = vld [vmem:[%s1864_s8 + $0x40] sm:$0xf] }
  0x38   : > { %1681 = vmatmul.mubr.msk.bf16.vlgmr.msra.gmra.mxu0 %vm586_vm2, %v1565_v4  ;;  %v730_v29 = vrot.slane %v728_v16, 4  ;;  %v736_v31 = vrot.slane %v734_v19, 5  ;;  %v711_v8 = vor.u32 %v710_v24, %v1966_v63  ;;  %v740_v15 = vrot.slane %v738_v20, 4  ;;  %v1544_v20 = vld [vmem:[%s1864_s8 + $0x48] sm:$0xf] }
  0x39   : > { %1699 = vmatpush3.bf16.msra.mxu0 %v1872_v11  ;;  %v721_v51 = vor.u32 %v720_v35, %v1970_v6  ;;  %v744_v32 = vshll.u32 %v337_v57, 16  ;;  %1695 = vmatmul.mubr.msk.bf16.gmra.mxu1 %vm484_vm5, %v1584_v38  ;;  %v1122_v5 = vshrl.u32 %v2049_v22, 16  ;;  %v1125_v25 = vshll.u32 %v2049_v22, 16  ;;  %v1537_v6 = vld [vmem:[%s1864_s8 + $0x1c] sm:$0xf] }
  0x3a   : > { %v731_v33 = vor.u32 %v730_v29, %v1972_v13  ;;  %v1131_v9 = vshll.u32 %v1535_v27, 16  ;;  %v712_v48 = vrot.slane %v711_v8, 4  ;;  %v741_v11 = vor.u32 %v740_v15, %v1984_v21 }
  0x3b   : > { %v722_v36 = vrot.slane %v721_v51, 4  ;;  %v746_v63 = vrot.slane %v744_v32, 5  ;;  %v1124_v30 = vrot.slane %v1122_v5, 4  ;;  %v1127_v41 = vrot.slane %v1125_v25, 5  ;;  %v1545_v51 = vld [vmem:[%s1864_s8 + $0x4c] sm:$0xf] }
  0x3c   : > { %v732_v37 = vrot.slane %v731_v33, 4  ;;  %v1133_v42 = vrot.slane %v1131_v9, 5  ;;  %v717_v13 = vsel %vm1895_vm6, %v712_v48, %v716_v26  ;;  %v742_v44 = vrot.slane %v741_v11, 4  ;;  %v1546_v32 = vld [vmem:[%s1864_s8 + $0x54] sm:$0xf] }
  0x3d   : > { %v727_v43 = vsel %vm1895_vm6, %v722_v36, %v726_v28  ;;  %v1136_v46 = vshrl.u32 %v1536_v34, 16  ;;  %v1128_v47 = vor.u32 %v1127_v41, %v1124_v30  ;;  %v1139_v50 = vshll.u32 %v1536_v34, 16  ;;  %v353_v25 = vld [vmem:[%s300_s12] sm:$0xf] }
  0x3e   : > { %v1566_v21 = vcombine.low %v717_v13, %v727_v43  ;;  %v737_v17 = vsel %vm1895_vm6, %v732_v37, %v736_v31  ;;  %v747_v10 = vsel %vm1895_vm6, %v742_v44, %v746_v63  ;;  %v1145_v54 = vshll.u32 %v1537_v6, 16  ;;  %v1547_v63 = vld [vmem:[%s1864_s8 + $0x58] sm:$0xf]  ;;  %v354_v43 = vld [vmem:[%s300_s12 + $0x4] sm:$0xf] }
  0x3f   : > { %v1138_v52 = vrot.slane %v1136_v46, 4  ;;  %v1150_v55 = vshrl.u32 %v2066_v53, 16  ;;  %v1567_v56 = vcombine.low %v737_v17, %v747_v10  ;;  %v1129_v57 = vrot.slane %v1128_v47, 4 }
  0x40   : > { %1684 = vmatprep.mubr.msk.bf16.mxu0 %vm586_vm2, %v1566_v21  ;;  %v1141_v58 = vrot.slane %v1139_v50, 5  ;;  %v1153_v60 = vshll.u32 %v2066_v53, 16  ;;  %v1147_v3 = vrot.slane %v1145_v54, 5  ;;  %v1159_v12 = vshll.u32 %v1539_v49, 16 }
  0x41   : > { %v1152_v61 = vrot.slane %v1150_v55, 4  ;;  %v1164_v4 = vshrl.u32 %v1540_v18, 16  ;;  %1685 = vmatmul.mubr.msk.bf16.gmra.mxu0 %vm586_vm2, %v1567_v56  ;;  %v1134_v62 = vsel %vm1895_vm6, %v1129_v57, %v1133_v42  ;;  %v1167_v1 = vshll.u32 %v1540_v18, 16 }
  0x42   : > { %v1142_v7 = vor.u32 %v1141_v58, %v1138_v52  ;;  %v1155_v0 = vrot.slane %v1153_v60, 5  ;;  %v1161_v45 = vrot.slane %v1159_v12, 5  ;;  %v1173_v16 = vshll.u32 %v1541_v59, 16 }
  0x43   : > { %v1166_v14 = vrot.slane %v1164_v4, 4  ;;  %v1590_v19 = vcombine.low %v2049_v22, %v1536_v34  ;;  %v1169_v26 = vrot.slane %v1167_v1, 5  ;;  %v1591_v35 = vcombine.low %v2066_v53, %v1540_v18 }
  0x44   : > { %v1143_v23 = vrot.slane %v1142_v7, 4  ;;  %v1156_v24 = vor.u32 %v1155_v0, %v1152_v61  ;;  %v1175_v27 = vrot.slane %v1173_v16, 5  ;;  %v1178_v38 = vshrl.u32 %v1542_v39, 16 }
  0x45   : > { %1700 = vmatprep.mubr.msk.bf16.mxu0 %vm586_vm2, %v1590_v19  ;;  %v1181_v28 = vshll.u32 %v1542_v39, 16  ;;  %v1187_v29 = vshll.u32 %v1543_v2, 16  ;;  %v1170_v8 = vor.u32 %v1169_v26, %v1166_v14  ;;  %v1192_v15 = vshrl.u32 %v1544_v20, 16 }
  0x46   : > { %v1148_v22 = vsel %vm1895_vm6, %v1143_v23, %v1147_v3  ;;  %v1157_v31 = vrot.slane %v1156_v24, 4  ;;  %v1180_v34 = vrot.slane %v1178_v38, 4  ;;  %v1195_v11 = vshll.u32 %v1544_v20, 16 }
  0x47   : > { %v1598_v33 = vcombine.low %v1134_v62, %v1148_v22  ;;  %v1183_v5 = vrot.slane %v1181_v28, 5  ;;  %v1171_v48 = vrot.slane %v1170_v8, 4  ;;  %v1194_v36 = vrot.slane %v1192_v15, 4 }
  0x48   : > { %v1162_v9 = vsel %vm1895_vm6, %v1157_v31, %v1161_v45  ;;  %v1201_v37 = vshll.u32 %v1545_v51, 16  ;;  %v1206_v30 = vshrl.u32 %v1546_v32, 16  ;;  %v1209_v41 = vshll.u32 %v1546_v32, 16 }
  0x49   : > { %1710 = vmatprep.mubr.msk.bf16.mxu1 %vm484_vm5, %v1598_v33  ;;  %v1184_v6 = vor.u32 %v1183_v5, %v1180_v34  ;;  %v1176_v42 = vsel %vm1895_vm6, %v1171_v48, %v1175_v27  ;;  %1701 = vmatmul.mubr.msk.bf16.vlgmr.msra.gmra.mxu0 %vm586_vm2, %v1591_v35  ;;  %v1189_v53 = vrot.slane %v1187_v29, 5  ;;  %v1197_v13 = vrot.slane %v1195_v11, 5 }
  0x4a   : > { %v1220_v44 = vshrl.u32 %v353_v25, 16  ;;  %v1599_v46 = vcombine.low %v1162_v9, %v1176_v42  ;;  %v1208_v17 = vrot.slane %v1206_v30, 4  ;;  %v1215_v47 = vshll.u32 %v1547_v63, 16 }
  0x4b   : > { %v1185_v21 = vrot.slane %v1184_v6, 4  ;;  %v1198_v50 = vor.u32 %v1197_v13, %v1194_v36  ;;  %v1203_v49 = vrot.slane %v1201_v37, 5  ;;  %v1211_v18 = vrot.slane %v1209_v41, 5 }
  0x4c   : > { %1711 = vmatmul.mubr.msk.bf16.vlgmr.msra.gmra.mxu1 %vm484_vm5, %v1599_v46  ;;  %v1222_v10 = vrot.slane %v1220_v44, 4  ;;  %v1223_v52 = vshll.u32 %v353_v25, 16  ;;  %v1229_v54 = vshll.u32 %v354_v43, 16  ;;  %v1592_v55 = vcombine.low %v1542_v39, %v1544_v20 }
  0x4d   : > { %v1190_v56 = vsel %vm1895_vm6, %v1185_v21, %v1189_v53  ;;  %v1199_v57 = vrot.slane %v1198_v50, 4  ;;  %v1212_v58 = vor.u32 %v1211_v18, %v1208_v17  ;;  %v1593_v59 = vcombine.low %v1546_v32, %v353_v25 }
  0x4e   : > { %v1217_v60 = vrot.slane %v1215_v47, 5  ;;  %v1225_v3 = vrot.slane %v1223_v52, 5  ;;  %1704 = vmatprep.mubr.msk.bf16.mxu0 %vm586_vm2, %v1592_v55  ;;  %v1231_v7 = vrot.slane %v1229_v54, 5  ;;  %v2125_v55 = vld [vmem:[%s2170_s3] ss:$0 sm:$0xff]  ;;  %vm1405_vm11 = vcmask 60416  }
  0x4f   : > { %v1204_v61 = vsel %vm1895_vm6, %v1199_v57, %v1203_v49  ;;  %v1213_v12 = vrot.slane %v1212_v58, 4 }
  0x50   : > { %v1600_v4 = vcombine.low %v1190_v56, %v1204_v61  ;;  %v1226_v62 = vor.u32 %v1225_v3, %v1222_v10 }
  0x51   : > { %1705 = vmatmul.mubr.msk.bf16.gmra.mxu0 %vm586_vm2, %v1593_v59  ;;  %v1218_v0 = vsel %vm1895_vm6, %v1213_v12, %v1217_v60 }
  0x52   : > { %1714 = vmatprep.mubr.msk.bf16.mxu1 %vm484_vm5, %v1600_v4  ;;  %v1227_v1 = vrot.slane %v1226_v62, 4 }
  0x54   : > { %v1232_v39 = vsel %vm1895_vm6, %v1227_v1, %v1231_v7 }
  0x55   : > { %v1601_v2 = vcombine.low %v1218_v0, %v1232_v39 }
  0x57   : > { %1715 = vmatmul.mubr.msk.bf16.gmra.mxu1 %vm484_vm5, %v1601_v2 }
  0xd8   : > { %v1672_v45 = vpop.f32.mrf.mxu1 }
  0xda   : > { %v637_v14 = vpop.f32.mrf.mxu1 }
  0xdc   : > { %v1673_v16 = vpop.f32.mrf.mxu1 }
  0xde   : > { %v640_v20 = vpop.f32.mrf.mxu1 }
  0xe2   : > { %v1662_v19 = vpop.f32.mrf.mxu0 }
  0xe3   : > { %v646_v11 = vadd.f32 %v1672_v45, %v1662_v19 }
  0xe4   : > { %v535_v23 = vpop.f32.mrf.mxu0 }
  0xe5   : > { %v638_v6 = vadd.f32 %v637_v14, %v535_v23 }
  0xe6   : > { %v1663_v26 = vpop.f32.mrf.mxu0 }
  0xe7   : > { %v1676_v24 = vpop.f32.mrf.mxu1  ;;  %v649_v42 = vadd.f32 %v1673_v16, %v1663_v26 }
  0xe8   : > { %v538_v38 = vpop.f32.mrf.mxu0 }
  0xe9   : > { %v653_v35 = vpop.f32.mrf.mxu1  ;;  %v641_v43 = vadd.f32 %v640_v20, %v538_v38 }
  0xeb   : > { %v1677_v27 = vpop.f32.mrf.mxu1 }
  0xed   : > { %v656_v28 = vpop.f32.mrf.mxu1 }
  0xf0   : > { %v1666_v29 = vpop.f32.mrf.mxu0 }
  0xf1   : > { %v1692_v22 = vpop.f32.mrf.mxu1  ;;  %v662_v10 = vadd.f32 %v1676_v24, %v1666_v29 }
  0xf2   : > { %v551_v31 = vpop.f32.mrf.mxu0 }
  0xf3   : > { %v973_v40 = vpop.f32.mrf.mxu1  ;;  %v654_v52 = vadd.f32 %v653_v35, %v551_v31 }
  0xf4   : > { %v1667_v8 = vpop.f32.mrf.mxu0 }
  0xf5   : > { %v1693_v51 = vpop.f32.mrf.mxu1  ;;  %v665_v58 = vadd.f32 %v1677_v27, %v1667_v8 }
  0xf6   : > { %v554_v15 = vpop.f32.mrf.mxu0 }
  0xf7   : > { %v976_v33 = vpop.f32.mrf.mxu1  ;;  %v657_v23 = vadd.f32 %v656_v28, %v554_v15 }
  0xf8   : > { %v1682_v32 = vpop.f32.mrf.mxu0 }
  0xf9   : > { %v1696_v25 = vpop.f32.mrf.mxu1  ;;  %v850_v37 = vadd.f32 %v1682_v32, %v646_v11 }
  0xfa   : > { %v817_v34 = vpop.f32.mrf.mxu0 }
  0xfb   : > { %v989_v48 = vpop.f32.mrf.mxu1  ;;  %v848_v53 = vadd.f32 %v817_v34, %v638_v6  ;;  %v1006_v21 = vadd.f32 %v1692_v22, %v850_v37 }
  0xfc   : > { %v1683_v5 = vpop.f32.mrf.mxu0 }
  0xfd   : > { %v1697_v30 = vpop.f32.mrf.mxu1  ;;  %v851_v44 = vadd.f32 %v1683_v5, %v649_v42  ;;  %v1004_v49 = vadd.f32 %v973_v40, %v848_v53 }
  0xfe   : > { %v820_v9 = vpop.f32.mrf.mxu0 }
  0xff   : > { %v2120_v46 = vpop.f32.mrf.mxu1  ;;  %v849_v47 = vadd.f32 %v820_v9, %v641_v43  ;;  %v1007_v57 = vadd.f32 %v1693_v51, %v851_v44 }
 0x101   : > { %v1686_v36 = vpop.f32.mrf.mxu0  ;;  %v1005_v62 = vadd.f32 %v976_v33, %v849_v47 }
 0x102   : > { %v854_v3 = vadd.f32 %v1686_v36, %v662_v10 }
 0x103   : > { %v833_v63 = vpop.f32.mrf.mxu0 }
 0x104   : > { %v852_v61 = vadd.f32 %v833_v63, %v654_v52  ;;  %v1010_v24 = vadd.f32 %v1696_v25, %v854_v3 }
 0x105   : > { %v1687_v41 = vpop.f32.mrf.mxu0 }
 0x106   : > { %v855_v39 = vadd.f32 %v1687_v41, %v665_v58  ;;  %v1008_v26 = vadd.f32 %v989_v48, %v852_v61 }
 0x107   : > { %v836_v13 = vpop.f32.mrf.mxu0 }
 0x108   : > { %v853_v31 = vadd.f32 %v836_v13, %v657_v23  ;;  %v1011_v32 = vadd.f32 %v1697_v30, %v855_v39 }
 0x109   : > { %v1702_v17 = vpop.f32.mrf.mxu0 }
 0x10a   : > { %v1115_v50 = vadd.f32 %v1702_v17, %v1006_v21  ;;  %v1009_v41 = vadd.f32 %v2120_v46, %v853_v31 }
 0x10b   : > { %v1082_v18 = vpop.f32.mrf.mxu0 }
 0x10c   : > { %v1712_v54 = vpop.f32.mrf.mxu1  ;;  %v1113_v56 = vadd.f32 %v1082_v18, %v1004_v49 }
 0x10d   : > { %v1328_v59 = vadd.f32 %v1712_v54, %v1115_v50  ;;  %v1703_v60 = vpop.f32.mrf.mxu0 }
 0x10e   : > { %v1295_v12 = vpop.f32.mrf.mxu1  ;;  %v1116_v4 = vadd.f32 %v1703_v60, %v1007_v57 }
 0x10f   : > { %v1343_v7 = vadd.f32 %v2125_v55, %v1328_v59  ;;  %v1326_v0 = vadd.f32 %v1295_v12, %v1113_v56  ;;  %v1085_v1 = vpop.f32.mrf.mxu0 }
 0x110   : > { %v1713_v2 = vpop.f32.mrf.mxu1  ;;  %v1114_v45 = vadd.f32 %v1085_v1, %v1005_v62 }
 0x111   : > { %vm1351_vm10 = vcmp.ge.f32.partialorder %v1343_v7, 0.0  ;;  %v1359_v14 = vmul.f32 0.1, %v1343_v7  ;;  %v1341_v16 = vadd.f32 %v2125_v55, %v1326_v0  ;;  %v1329_v19 = vadd.f32 %v1713_v2, %v1116_v4  ;;  %v1706_v20 = vpop.f32.mrf.mxu0 }
 0x112   : > { %v1298_v38 = vpop.f32.mrf.mxu1  ;;  %v1119_v8 = vadd.f32 %v1706_v20, %v1010_v24 }
 0x113   : > { %v1367_v35 = vsel %vm1351_vm10, %v1343_v7, %v1359_v14  ;;  %vm1349_vm12 = vcmp.ge.f32.partialorder %v1341_v16, 0.0  ;;  %v1357_v27 = vmul.f32 0.1, %v1341_v16  ;;  %v1344_v29 = vadd.f32 %v2125_v55, %v1329_v19  ;;  %v1098_v22 = vpop.f32.mrf.mxu0 }
 0x114   : > { %v1622_v40 = vpack.c.bf16 %v1367_v35, %v1367_v35  ;;  %v1327_v28 = vadd.f32 %v1298_v38, %v1114_v45  ;;  %v1117_v25 = vadd.f32 %v1098_v22, %v1008_v26 }
 0x115   : > { %v1365_v51 = vsel %vm1349_vm12, %v1341_v16, %v1357_v27  ;;  %vm1352_vm13 = vcmp.ge.f32.partialorder %v1344_v29, 0.0  ;;  %v1360_v15 = vmul.f32 0.1, %v1344_v29  ;;  %v1707_v33 = vpop.f32.mrf.mxu0 }
 0x116   : > { %1408 = vst.msk [vmem:[%s2133_s22 + $0x8] sm:$0xf] %vm1405_vm11, %v1622_v40  ;;  %v1620_v34 = vpack.c.bf16 %v1365_v51, %v1365_v51  ;;  %v1342_v5 = vadd.f32 %v2125_v55, %v1327_v28  ;;  %v1120_v36 = vadd.f32 %v1707_v33, %v1011_v32 }
 0x117   : > { %v1368_v9 = vsel %vm1352_vm13, %v1344_v29, %v1360_v15  ;;  %v1716_v48 = vpop.f32.mrf.mxu1  ;;  %v1101_v37 = vpop.f32.mrf.mxu0 }
 0x118   : > { %1406 = vst.msk [vmem:[%s2133_s22] sm:$0xf] %vm1405_vm11, %v1620_v34  ;;  %v1623_v11 = vpack.c.bf16 %v1368_v9, %v1368_v9  ;;  %vm1350_vm14 = vcmp.ge.f32.partialorder %v1342_v5, 0.0  ;;  %v1358_v63 = vmul.f32 0.1, %v1342_v5  ;;  %v1332_v6 = vadd.f32 %v1716_v48, %v1119_v8 }
 0x119   : > { %v1311_v30 = vpop.f32.mrf.mxu1  ;;  %v1118_v21 = vadd.f32 %v1101_v37, %v1009_v41 }
 0x11a   : > { %1409 = vst.msk [vmem:[%s2133_s22 + $0xc] sm:$0xf] %vm1405_vm11, %v1623_v11  ;;  %v1366_v42 = vsel %vm1350_vm14, %v1342_v5, %v1358_v63  ;;  %v1347_v53 = vadd.f32 %v2125_v55, %v1332_v6  ;;  %v1330_v13 = vadd.f32 %v1311_v30, %v1117_v25 }
 0x11b   : > { %v1621_v43 = vpack.c.bf16 %v1366_v42, %v1366_v42  ;;  %v1717_v44 = vpop.f32.mrf.mxu1 }
 0x11c   : > { %vm1355_vm15 = vcmp.ge.f32.partialorder %v1347_v53, 0.0  ;;  %v1363_v17 = vmul.f32 0.1, %v1347_v53  ;;  %v1345_v47 = vadd.f32 %v2125_v55, %v1330_v13  ;;  %v1333_v50 = vadd.f32 %v1717_v44, %v1120_v36 }
 0x11d   : > { %1407 = vst.msk [vmem:[%s2133_s22 + $0x4] sm:$0xf] %vm1405_vm11, %v1621_v43  ;;  %v1314_v18 = vpop.f32.mrf.mxu1 }
 0x11e   : > { %v1371_v49 = vsel %vm1355_vm15, %v1347_v53, %v1363_v17  ;;  %vm1353_vm0 = vcmp.ge.f32.partialorder %v1345_v47, 0.0  ;;  %v1361_v46 = vmul.f32 0.1, %v1345_v47  ;;  %v1348_v10 = vadd.f32 %v2125_v55, %v1333_v50 }
 0x11f   : > { %v1626_v52 = vpack.c.bf16 %v1371_v49, %v1371_v49  ;;  %v1331_v54 = vadd.f32 %v1314_v18, %v1118_v21 }
 0x120   : > { %v1369_v56 = vsel %vm1353_vm0, %v1345_v47, %v1361_v46  ;;  %vm1356_vm1 = vcmp.ge.f32.partialorder %v1348_v10, 0.0  ;;  %v1364_v57 = vmul.f32 0.1, %v1348_v10 }
 0x121   : > { %1412 = vst.msk [vmem:[%s2133_s22 + $0x18] sm:$0xf] %vm1405_vm11, %v1626_v52  ;;  %v1624_v58 = vpack.c.bf16 %v1369_v56, %v1369_v56  ;;  %v1346_v59 = vadd.f32 %v2125_v55, %v1331_v54 }
 0x122   : > { %v1372_v60 = vsel %vm1356_vm1, %v1348_v10, %v1364_v57 }
 0x123   : > { %1410 = vst.msk [vmem:[%s2133_s22 + $0x10] sm:$0xf] %vm1405_vm11, %v1624_v58  ;;  %v1627_v3 = vpack.c.bf16 %v1372_v60, %v1372_v60  ;;  %vm1354_vm2 = vcmp.ge.f32.partialorder %v1346_v59, 0.0  ;;  %v1362_v61 = vmul.f32 0.1, %v1346_v59 }
 0x125   : > { %1413 = vst.msk [vmem:[%s2133_s22 + $0x1c] sm:$0xf] %vm1405_vm11, %v1627_v3  ;;  %v1370_v12 = vsel %vm1354_vm2, %v1346_v59, %v1362_v61 }
 0x126   : > { %v1625_v4 = vpack.c.bf16 %v1370_v12, %v1370_v12 }
 0x128   : > { %1411 = vst.msk [vmem:[%s2133_s22 + $0x14] sm:$0xf] %vm1405_vm11, %v1625_v4 }
 0x129 PF: > { %s14_s17 = sadd.s32 1, %s1782_s17   ;;  %s2176_s15 = smov %s1778_s16 }
 0x12a   : > { %p11_p5 = scmp.ge.s32.totalorder %s14_s17, 4   ;;  %s2177_s16 = smov %s2179_s18 }
 0x12c   :  { %13 = sbr.rel (!%p11_p5) target bundleno = 2 (0x2), region = 70 }

</bundles_post_ra>
